<compile_context>
chip_gen: v6e
topology: v6e:2x2x1
jax: 0.10.0
libtpu: 0.0.40
codegen_flags: <defaults>
</compile_context>

<pallas_src>
import functools

import jax
import jax.numpy as jnp
from jax.experimental import pallas as pl
from jax.experimental.pallas import tpu as pltpu


def _l3d_loss_kernel(pred_ref, tgt_ref, out_ref, acc_ref, *, n_valid, tile):
    # pred_ref / tgt_ref : (24, tile) sublane/lane-dense blocks in VMEM
    # out_ref            : (1, 1) f32 per-core partial sum in SMEM
    # acc_ref            : (8, tile) f32 VMEM running elementwise accumulator
    c = pl.program_id(0)                  # core slice of the column range
    i = pl.program_id(1)                  # column tile within this core
    tiles_per_core = pl.num_programs(1)

    @pl.when(i == 0)
    def _init():
        acc_ref[...] = jnp.zeros_like(acc_ref)

    p = pred_ref[...].astype(jnp.float32)                # (24, tile)
    t = tgt_ref[...].astype(jnp.float32)
    d = p - t
    sq = d * d
    # Rows [0:8)=x, [8:16)=y, [16:24)=z -> vreg-aligned slices, pure VPU adds.
    ssq = sq[0:8, :] + sq[8:16, :] + sq[16:24, :]        # (8, tile)
    dist = jnp.sqrt(jnp.maximum(ssq, 1e-8))              # clamp + sqrt (EUP)

    # Mask zero-padded joints and the OOB tail of partial / clamped blocks.
    # The mask uses the NOMINAL block index so redundant clamped blocks
    # contribute exactly zero; jnp.where keeps NaN/Inf garbage out of the sum.
    block = c * tiles_per_core + i
    g_iota = jax.lax.broadcasted_iota(jnp.int32, (8, tile), 1)
    s_iota = jax.lax.broadcasted_iota(jnp.int32, (8, tile), 0)
    joint = (block * tile + g_iota) * 8 + s_iota
    dist = jnp.where(joint < n_valid, dist, 0.0)

    acc_ref[...] += dist

    @pl.when(i == tiles_per_core - 1)
    def _finalize():
        out_ref[0, 0] = jnp.sum(acc_ref[...])


def _fold_dense(x, n, n8):
    """[B, J, 3] -> (24, n8//8): row = coord*8 + (joint % 8), col = joint // 8."""
    g = n8 // 8
    x = x.reshape(n, 3)
    if n8 != n:
        x = jnp.pad(x, ((0, n8 - n), (0, 0)))
    x = x.reshape(g, 8, 3)                 # [group, sub-joint, coord]
    x = jnp.transpose(x, (2, 1, 0))        # [coord, sub-joint, group]
    return x.reshape(24, g)                # native dtype preserved


def l3d_loss(pred_3d: jax.Array, target_3d: jax.Array, *,
             tile_cols: int = 16384) -> jax.Array:
    """L2 3D-pose consistency loss. pred_3d / target_3d: [B, J, 3]."""
    assert pred_3d.shape == target_3d.shape
    assert pred_3d.ndim == 3 and pred_3d.shape[-1] == 3
    b, j, _ = pred_3d.shape
    n = b * j
    n8 = pl.cdiv(n, 8) * 8
    g_total = n8 // 8

    p = _fold_dense(pred_3d, n, n8)        # (24, g_total), native dtype
    t = _fold_dense(target_3d, n, n8)

    lane = 128
    if g_total <= tile_cols:
        tile = g_total                     # single block == full lane extent
    else:
        tile = max(lane, (tile_cols // lane) * lane)
    num_tiles = pl.cdiv(g_total, tile)
    num_cores = 2 if num_tiles >= 2 else 1
    tiles_per_core = pl.cdiv(num_tiles, num_cores)
    last_block = num_tiles - 1

    def in_map(c, i):
        # Clamp: a core's trailing step past the real block range re-reads the
        # last valid block; the in-kernel mask (nominal index) zeroes it.
        return (0, jnp.minimum(c * tiles_per_core + i, last_block))

    kernel = functools.partial(_l3d_loss_kernel, n_valid=n, tile=tile)

    partial_sums = pl.pallas_call(
        kernel,
        out_shape=jax.ShapeDtypeStruct((num_cores, 1), jnp.float32),
        grid_spec=pltpu.PrefetchScalarGridSpec(
            num_scalar_prefetch=0,
            grid=(num_cores, tiles_per_core),
            in_specs=[
                # (24, tile): sublane dim 24 (full dim, multiple of 8) is
                # dense; lane dim is a multiple of 128 or the full extent.
                pl.BlockSpec((24, tile), in_map),
                pl.BlockSpec((24, tile), in_map),
            ],
            out_specs=pl.BlockSpec((1, 1), lambda c, i: (c, 0),
                                   memory_space=pltpu.SMEM),
            scratch_shapes=[pltpu.VMEM((8, tile), jnp.float32)],
        ),
        compiler_params=pltpu.CompilerParams(
            # Column range split across cores (v7x megacore); the carried
            # accumulator axis stays "arbitrary".
            dimension_semantics=("parallel", "arbitrary"),
            vmem_limit_bytes=32 * 1024 * 1024,
        ),
    )(p, t)
    return jnp.sum(partial_sums) * (1.0 / n)


def _reference(pred_3d, target_3d):
    p = pred_3d.astype(jnp.float32)
    t = target_3d.astype(jnp.float32)
    sq = jnp.sum((p - t) ** 2, axis=-1)
    return jnp.mean(jnp.sqrt(jnp.maximum(sq, 1e-8)))


if __name__ == "__main__":
    key = jax.random.PRNGKey(0)
    k1, k2, k3, k4, k5, k6 = jax.random.split(key, 6)

    # Case 1: pose-sized input (B=2, J=17) -> single (24, 5) block, 1 core.
    pred = jax.random.normal(k1, (2, 17, 3), dtype=jnp.float32)
    tgt = jax.random.normal(k2, (2, 17, 3), dtype=jnp.float32)
    loss = jax.block_until_ready(l3d_loss(pred, tgt))
    ref = _reference(pred, tgt)
    assert jnp.allclose(loss, ref, rtol=1e-5, atol=1e-6), (loss, ref)

    # Case 2: 2 blocks across 2 cores, partial last block
    #         (B=16, J=68 -> n=1088 -> G=136, tile=128).
    pred_b = jax.random.normal(k3, (16, 68, 3), dtype=jnp.float32)
    tgt_b = jax.random.normal(k4, (16, 68, 3), dtype=jnp.float32)
    loss_b = jax.block_until_ready(l3d_loss(pred_b, tgt_b, tile_cols=128))
    ref_b = _reference(pred_b, tgt_b)
    assert jnp.allclose(loss_b, ref_b, rtol=1e-5, atol=1e-6), (loss_b, ref_b)

    # Case 3: odd block count -> exercises the clamped redundant block path
    #         (B=32, J=80 -> n=2560 -> G=320, tile=128 -> 3 blocks, 2 cores).
    pred_c = jax.random.normal(k5, (32, 80, 3), dtype=jnp.float32)
    tgt_c = jax.random.normal(k6, (32, 80, 3), dtype=jnp.float32)
    loss_c = jax.block_until_ready(l3d_loss(pred_c, tgt_c, tile_cols=128))
    ref_c = _reference(pred_c, tgt_c)
    assert jnp.allclose(loss_c, ref_c, rtol=1e-5, atol=1e-6), (loss_c, ref_c)

    # Case 4: bf16 inputs stay bf16 through the pallas_call (in-kernel upcast).
    pred_h = pred.astype(jnp.bfloat16)
    tgt_h = tgt.astype(jnp.bfloat16)
    loss_h = jax.block_until_ready(l3d_loss(pred_h, tgt_h))
    ref_h = _reference(pred_h, tgt_h)
    assert jnp.allclose(loss_h, ref_h, rtol=2e-2, atol=2e-2), (loss_h, ref_h)

    print("KERNEL_OK")
</pallas_src>

<mosaic_0001>
module attributes {stable_mosaic.version = 11 : i64} {
  func.func @_l3d_loss_kernel(%arg0: i32, %arg1: i32, %arg2: memref<24x5xf32, #tpu.memory_space<vmem>>, %arg3: memref<24x5xf32, #tpu.memory_space<vmem>>, %arg4: memref<1x1xf32, #tpu.memory_space<smem>>, %arg5: memref<8x5xf32, #tpu.memory_space<vmem>>) attributes {dimension_semantics = [#tpu.dimension_semantics<parallel>, #tpu.dimension_semantics<arbitrary>], iteration_bounds = array<i64: 1, 1>, scalar_prefetch = 0 : i64, scratch_operands = 1 : i64, tpu.core_type = #tpu.core_type<tc>, window_params = [{transform_indices = @transform_0, window_bounds = array<i64: 24, 5>}, {transform_indices = @transform_1, window_bounds = array<i64: 24, 5>}, {transform_indices = @transform_2, window_bounds = array<i64: 1, 1>}]} {
    %c0_i32 = arith.constant 0 : i32
    %0 = arith.cmpi eq, %arg1, %c0_i32 : i32
    %1 = arith.extui %0 : i1 to i32
    %c0_i32_0 = arith.constant 0 : i32
    %2 = arith.cmpi ne, %1, %c0_i32_0 : i32
    scf.if %2 {
      %cst_11 = arith.constant 0.000000e+00 : f32
      %35 = vector.broadcast %cst_11 : f32 to vector<8x5xf32>
      %c0_12 = arith.constant 0 : index
      %c0_13 = arith.constant 0 : index
      %36 = vector.load %arg5[%c0_12, %c0_13] : memref<8x5xf32, #tpu.memory_space<vmem>>, vector<8x5xf32>
      tpu.vector_store %arg5[%c0_12, %c0_13], %35 {strides = array<i32>} : memref<8x5xf32, #tpu.memory_space<vmem>>, vector<8x5xf32>,
    } else {
    }
    %c0 = arith.constant 0 : index
    %c0_1 = arith.constant 0 : index
    %3 = vector.load %arg2[%c0, %c0_1] : memref<24x5xf32, #tpu.memory_space<vmem>>, vector<24x5xf32>
    %c0_2 = arith.constant 0 : index
    %c0_3 = arith.constant 0 : index
    %4 = vector.load %arg3[%c0_2, %c0_3] : memref<24x5xf32, #tpu.memory_space<vmem>>, vector<24x5xf32>
    %5 = arith.subf %3, %4 : vector<24x5xf32>
    %6 = arith.mulf %5, %5 : vector<24x5xf32>
    %7 = vector.extract_strided_slice %6 {offsets = [0, 0], sizes = [8, 5], strides = [1, 1]} : vector<24x5xf32> to vector<8x5xf32>
    %8 = vector.extract_strided_slice %6 {offsets = [8, 0], sizes = [8, 5], strides = [1, 1]} : vector<24x5xf32> to vector<8x5xf32>
    %9 = arith.addf %7, %8 : vector<8x5xf32>
    %10 = vector.extract_strided_slice %6 {offsets = [16, 0], sizes = [8, 5], strides = [1, 1]} : vector<24x5xf32> to vector<8x5xf32>
    %11 = arith.addf %9, %10 : vector<8x5xf32>
    %cst = arith.constant 9.99999993E-9 : f32
    %12 = vector.broadcast %cst : f32 to vector<8x5xf32>
    %13 = arith.maximumf %11, %12 : vector<8x5xf32>
    %14 = math.sqrt %13 : vector<8x5xf32>
    %c1_i32 = arith.constant 1 : i32
    %15 = arith.muli %arg0, %c1_i32 : i32
    %16 = arith.addi %15, %arg1 : i32
    %17 = tpu.iota {dimensions = array<i32: 1>} : vector<8x5xi32>
    %18 = tpu.iota {dimensions = array<i32: 0>} : vector<8x5xi32>
    %c5_i32 = arith.constant 5 : i32
    %19 = arith.muli %16, %c5_i32 : i32
    %20 = vector.broadcast %19 : i32 to vector<8x5xi32>
    %21 = arith.addi %20, %17 : vector<8x5xi32>
    %c8_i32 = arith.constant 8 : i32
    %22 = vector.broadcast %c8_i32 : i32 to vector<8x5xi32>
    %23 = arith.muli %21, %22 : vector<8x5xi32>
    %24 = arith.addi %23, %18 : vector<8x5xi32>
    %c34_i32 = arith.constant 34 : i32
    %25 = vector.broadcast %c34_i32 : i32 to vector<8x5xi32>
    %26 = arith.cmpi slt, %24, %25 : vector<8x5xi32>
    %cst_4 = arith.constant 0.000000e+00 : f32
    %27 = vector.broadcast %cst_4 : f32 to vector<8x5xf32>
    %28 = arith.select %26, %14, %27 : vector<8x5xi1>, vector<8x5xf32>
    %c0_5 = arith.constant 0 : index
    %c0_6 = arith.constant 0 : index
    %29 = vector.load %arg5[%c0_5, %c0_6] : memref<8x5xf32, #tpu.memory_space<vmem>>, vector<8x5xf32>
    %30 = arith.addf %29, %28 : vector<8x5xf32>
    %c0_7 = arith.constant 0 : index
    %c0_8 = arith.constant 0 : index
    %31 = vector.load %arg5[%c0_7, %c0_8] : memref<8x5xf32, #tpu.memory_space<vmem>>, vector<8x5xf32>
    tpu.vector_store %arg5[%c0_7, %c0_8], %30 {strides = array<i32>} : memref<8x5xf32, #tpu.memory_space<vmem>>, vector<8x5xf32>,
    %c0_i32_9 = arith.constant 0 : i32
    %32 = arith.cmpi eq, %arg1, %c0_i32_9 : i32
    %33 = arith.extui %32 : i1 to i32
    %c0_i32_10 = arith.constant 0 : i32
    %34 = arith.cmpi ne, %33, %c0_i32_10 : i32
    scf.if %34 {
      %c0_11 = arith.constant 0 : index
      %c0_12 = arith.constant 0 : index
      %35 = vector.load %arg5[%c0_11, %c0_12] : memref<8x5xf32, #tpu.memory_space<vmem>>, vector<8x5xf32>
      %36 = vector.shape_cast %35 : vector<8x5xf32> to vector<1x8x5xf32>
      %cst_13 = arith.constant dense<0.000000e+00> : vector<1xf32>
      %37 = vector.multi_reduction <add>, %36, %cst_13 [1, 2] : vector<1x8x5xf32> to vector<1xf32>
      %38 = vector.shape_cast %37 : vector<1xf32> to vector<1x1x1xf32>
      %39 = vector.extract %38[0, 0, 0] : f32 from vector<1x1x1xf32>
      %c0_14 = arith.constant 0 : index
      %c0_15 = arith.constant 0 : index
      %40 = memref.load %arg4[%c0_14, %c0_15] : memref<1x1xf32, #tpu.memory_space<smem>>
      memref.store %39, %arg4[%c0_14, %c0_15] : memref<1x1xf32, #tpu.memory_space<smem>>
    } else {
    }
    return
  }
  func.func @transform_0(%arg0: i32, %arg1: i32) -> (i32, i32) {
    %c1_i32 = arith.constant 1 : i32
    %0 = arith.muli %arg0, %c1_i32 : i32
    %1 = arith.addi %0, %arg1 : i32
    %c0_i32 = arith.constant 0 : i32
    %2 = arith.minsi %1, %c0_i32 : i32
    %c0_i32_0 = arith.constant 0 : i32
    %c0_i32_1 = arith.constant 0 : i32
    return %c0_i32_0, %2 : i32, i32
  }
  func.func @transform_1(%arg0: i32, %arg1: i32) -> (i32, i32) {
    %c1_i32 = arith.constant 1 : i32
    %0 = arith.muli %arg0, %c1_i32 : i32
    %1 = arith.addi %0, %arg1 : i32
    %c0_i32 = arith.constant 0 : i32
    %2 = arith.minsi %1, %c0_i32 : i32
    %c0_i32_0 = arith.constant 0 : i32
    %c0_i32_1 = arith.constant 0 : i32
    return %c0_i32_0, %2 : i32, i32
  }
  func.func @transform_2(%arg0: i32, %arg1: i32) -> (i32, i32) {
    %c0_i32 = arith.constant 0 : i32
    %c0_i32_0 = arith.constant 0 : i32
    return %arg0, %c0_i32 : i32, i32
  }
}

</mosaic_0001>

<bundles_post_ra>
// kernel: tpu_custom_call.1
= control target key start
LH: loop header
LB: loop body
LE: loop exit
PB: predicated region body
PF: predicated region fallthrough
CT: control target
= control target key end

     0   :  { %vm70_vm0 = vcmask 39936   ;;  %v167_v3 = vmov 0.0   ;;  %s208_s0 = inlined_call_operand.vmem [shape: f32[24,5], index: 0, kind: input, shape index: {}]   ;;  %s209_s1 = inlined_call_operand.vmem [shape: f32[24,5], index: 1, kind: input, shape index: {}]   ;;  %s210_s2 = inlined_call_operand.hbm [shape: f32[1,1], index: 2, kind: output, shape index: {}]  }
   0x1   :  { %v72_v0 = vld [vmem:[%s208_s0] sm:$0xff]  ;;  %v73_v1 = vld [vmem:[%s208_s0 + $0x8] sm:$0xff]  ;;  %v74_v2 = vld [vmem:[%s208_s0 + $0x10] sm:$0xff]  ;;  %71 = vst.msk [vmem:[#allocation2] sm:$0xff] %vm70_vm0, %v167_v3 }
   0x2   :  { %v75_v4 = vld [vmem:[%s209_s1] sm:$0xff]  ;;  %v76_v5 = vld [vmem:[%s209_s1 + $0x8] sm:$0xff]  ;;  %v77_v6 = vld [vmem:[%s209_s1 + $0x10] sm:$0xff] }
   0x3   :  { %v78_v7 = vsub.f32 %v72_v0, %v75_v4  ;;  %v79_v8 = vsub.f32 %v73_v1, %v76_v5  ;;  %v80_v9 = vsub.f32 %v74_v2, %v77_v6 }
   0x4   :  { %7 = vsyncpa [#allocation4], 0  ;;  %v95_v16 = vlaneseq  ;;  %s168_s1 = smov [#allocation3]  }
   0x5   :  { %v81_v10 = vmul.f32 %v78_v7, %v78_v7  ;;  %v82_v11 = vmul.f32 %v79_v8, %v79_v8  ;;  %v83_v12 = vmul.f32 %v80_v9, %v80_v9 }
   0x6   :  { %v96_v17 = vand.u32 127, %v95_v16  ;;  %v98_v18 = vshrl.u32 %v95_v16, 7 }
   0x7   :  { %v84_v13 = vadd.f32 %v82_v11, %v81_v10 }
   0x8   :  { %v102_v19 = vmul.u32 8, %v96_v17  ;;  %v106_v25 = vld [vmem:[#allocation2] sm:$0xff] }
   0x9   :  { %v85_v14 = vadd.f32 %v84_v13, %v83_v12 }
   0xa   :  { %v103_v20 = vadd.s32 %v102_v19, %v98_v18 }
   0xb   :  { %v86_v15 = vmax.f32 %v85_v14, 1e-08 }
   0xc   :  { %vm104_vm3 = vcmp.lt.s32.totalorder %v103_v20, 34 }
   0xd   :  { %155 = vrsqrt.f32 %v86_v15  ;;  %vm89_vm1 = vcmp.eq.f32.partialorder %v86_v15, inf  ;;  %v92_v22 = vand.u32 2147483648, %v86_v15  ;;  %vm91_vm2 = vcmp.eq.f32.partialorder %v86_v15, 0.0 }
  0x1a   :  { %v156_v21 = vpop.eup %155 }
  0x1b   :  { %v88_v23 = vmul.f32 %v156_v21, %v86_v15 }
  0x1d   :  { %v90_v24 = vsel %vm89_vm1, %v86_v15, %v88_v23 }
  0x1e   :  { %v93_v26 = vsel %vm91_vm2, %v92_v22, %v90_v24 }
  0x1f   :  { %v105_v27 = vsel %vm104_vm3, %v93_v26, 0.0 }
  0x20   :  { %v107_v28 = vadd.f32 %v106_v25, %v105_v27 }
  0x22   :  { %109 = vst.msk [vmem:[#allocation2] sm:$0xff] %vm70_vm0, %v107_v28 }
  0x29   :  { %v113_v29 = vld [vmem:[#allocation2] sm:$0xff] }
  0x2a   :  { %v114_v30 = vsel %vm70_vm0, %v113_v29, 0.0 }
  0x2b   :  { %115 = vadd.xlane.f32.xlu0 %v114_v30 }
  0xb4   :  { %v116_v31 = vpop.xlane.xlu0 %115 }
  0xb5   :  { %v117_v32 = vrot.slane %v116_v31, 4 }
  0xb7   :  { %v118_v33 = vadd.f32 %v117_v32, %v116_v31 }
  0xb9   :  { %v119_v34 = vrot.slane %v118_v33, 2 }
  0xbb   :  { %v120_v35 = vadd.f32 %v119_v34, %v118_v33 }
  0xbd   :  { %v121_v36 = vrot.slane %v120_v35, 1 }
  0xbf   :  { %v122_v37 = vadd.f32 %v121_v36, %v120_v35 }
  0xc1   :  { %151 = vpush %v122_v37 }
  0xf2   :  { %s152_s0 = spop %151 }
  0xf3   :  { %125 = sst [smem:[#allocation3]] %s152_s0 }
  0xf4   :  { %133 = dma.smem_to_hbm %s168_s1, 16, %s210_s2, [#allocation4]  }
  0xf5   :  { %165 = dma.done.wait [#allocation4], 16  }
  0xf6   :  { %166 = vsyncadd [#allocation4], 4294967280 }
  0xf7   :  { %137 = sfence }
  0xf8   :  { %138 = vsyncpa [#allocation4], 1 }

</bundles_post_ra>
